<compile_context>
chip_gen: v7x
topology: tpu7x:2x2x1
jax: 0.10.0
libtpu: 0.0.40
codegen_flags: <defaults>
</compile_context>

<pallas_src>
import functools

import numpy as np
import jax
import jax.numpy as jnp
from jax import lax
from jax.experimental import pallas as pl
from jax.experimental.pallas import tpu as pltpu

LANE = 128


def _round_up(x, m):
    return (x + m - 1) // m * m


# ----------------------------- quantizers (glue) -----------------------------
def quantize_weight_gemm_S(w):
    """Symmetric per-tensor int8 fake-quant: integer-valued weights + scale."""
    w = np.asarray(w, dtype=np.float32)
    scale = float(np.max(np.abs(w))) / 127.0
    wq = np.clip(np.round(w / scale), -127.0, 127.0).astype(np.float32)
    return wq, scale


def quantize_bias_gemm(b):
    """Fake-quant bias to a fixed 1/256 grid."""
    b = np.asarray(b, dtype=np.float32)
    return (np.round(b * 256.0) / 256.0).astype(np.float32)


# ----------------------------- parameter setup --------------------------------
def build_params(key, in_planes, planes, act_scale):
    k1, k2, k3, k4, k5, k6 = jax.random.split(key, 6)
    w1 = 0.2 * jax.random.normal(k1, (planes, in_planes, 3, 3), jnp.float32)
    b1 = 0.1 * jax.random.normal(k2, (planes,), jnp.float32)
    w2 = 0.2 * jax.random.normal(k3, (planes, planes, 3, 3), jnp.float32)
    b2 = 0.1 * jax.random.normal(k4, (planes,), jnp.float32)
    wsc = 0.2 * jax.random.normal(k5, (planes, in_planes, 1, 1), jnp.float32)
    bsc = 0.1 * jax.random.normal(k6, (planes,), jnp.float32)

    s0, s1 = float(act_scale[0]), float(act_scale[1])
    w1q, c1 = quantize_weight_gemm_S(w1)
    w2q, c2 = quantize_weight_gemm_S(w2)
    wscq, csc = quantize_weight_gemm_S(wsc)
    # bias / (conv_scale * bias_scale)  (bias_scale == act_scale in the module)
    b1_eff = (quantize_bias_gemm(b1) / (c1 * s0)).astype(np.float32)
    b2_eff = (quantize_bias_gemm(b2) / (c2 * s1)).astype(np.float32)
    bsc_eff = (quantize_bias_gemm(bsc) / (csc * s0)).astype(np.float32)
    return dict(w1q=w1q, w2q=w2q, wscq=wscq, b1=b1_eff, b2=b2_eff, bsc=bsc_eff,
                c1=c1, c2=c2, csc=csc, s0=s0, s1=s1)


# ------------------- roll-convention probe (one tiny kernel) ------------------
@functools.lru_cache(maxsize=None)
def _roll_sign():
    """Return sign s so that pltpu.roll(x, (s*k) % n, axis=0)[p] == x[(p+k) % n].

    Makes the kernel correct under either rotate convention; the wrapped rows
    themselves are never read (asserted in the wrapper)."""
    def probe(x_ref, o_ref):
        o_ref[...] = pltpu.roll(x_ref[...], 1, axis=0)

    x = jnp.arange(8 * LANE, dtype=jnp.int32).reshape(8, LANE)
    y = np.asarray(pl.pallas_call(
        probe, out_shape=jax.ShapeDtypeStruct((8, LANE), jnp.int32))(x))
    if int(y[0, 0]) == 1 * LANE:      # roll(x, +1)[p] == x[p + 1]
        return 1
    if int(y[0, 0]) == 7 * LANE:      # jnp.roll convention: roll(x, -1)[p] == x[p + 1]
        return -1
    raise RuntimeError("unexpected pltpu.roll convention")


# ----------------------------- fused block kernel -----------------------------
def _make_kernel(P1PAD, P2, Wc, k1, inv_s1, k2, ksc, roll_sign):
    def shift_down(x, k):
        # result[p] == x[p + k]; the k wrapped rows at the bottom are never read
        # because P2 + 2*Wc + 2 <= P1PAD (asserted in the wrapper).
        if k == 0:
            return x
        return pltpu.roll(x, (roll_sign * k) % P1PAD, axis=0)

    def kernel(a1_ref, mask_ref, w1_ref, b1_ref, w2_ref, b2_ref,
               wsc_ref, bsc_ref, out_ref):
        a1 = a1_ref[...]                               # (P1PAD, 128) bf16 im2col of xq

        # ---- conv1: ONE lane-dense matmul over the concatenated 9*Cin K axis ----
        acc1 = jnp.dot(a1, w1_ref[...], preferred_element_type=jnp.float32)
        # folded epilogue: ((acc1 + b1_eff) * c1) clipped to [0, 6/s0], then * s0
        h = acc1 * k1 + b1_ref[...]
        h = jnp.clip(h, 0.0, 6.0)
        # quantize_activations_gemm_A(., s1); h >= 0 so the -127 bound never binds
        yq = jnp.clip(jnp.round(h * inv_s1), 0.0, 127.0)
        y = yq * mask_ref[...]                         # zero conv2 halo / padding positions

        # ---- conv2: column taps via 2 XLU rolls (f32), one bf16 cast per column
        # phase, row taps as 16-aligned static slices, 9 lane-dense MXU matmuls ----
        y16 = [shift_down(y, kx).astype(jnp.bfloat16) for kx in range(3)]
        acc2 = None
        for ky in range(3):
            base = ky * Wc
            for kx in range(3):
                d = jnp.dot(y16[kx][base:base + P2], w2_ref[3 * ky + kx],
                            preferred_element_type=jnp.float32)
                acc2 = d if acc2 is None else acc2 + d
        o2 = acc2 * k2 + b2_ref[...]

        # ---- 1x1 shortcut on the quantized input: reuse the centre tap (lanes
        # [8*Cin, 9*Cin)) of the A1 operand; rows [0, P2) line up with the output ----
        res = jnp.dot(a1[:P2], wsc_ref[...], preferred_element_type=jnp.float32)
        res = res * ksc + bsc_ref[...]

        out_ref[...] = jnp.clip(o2 + res, 0.0, 6.0)    # final ReLU6

    return kernel


# ----------------------------- Pallas forward ---------------------------------
def basic_block_pallas(x_nchw, p):
    N, Cin, H, W = map(int, x_nchw.shape)
    Cout = int(p["w1q"].shape[0])
    assert 9 * Cin <= LANE, "single-matmul conv1 needs 9*Cin <= 128 (tile K otherwise)"
    assert Cout <= LANE, "tile the output-channel axis for Cout > 128"

    s0, s1 = p["s0"], p["s1"]
    c1, c2, csc = p["c1"], p["c2"], p["csc"]
    inv_s0, inv_s1 = 1.0 / s0, 1.0 / s1
    k1, k2, ksc = c1 * s0, c2 * s1, csc * s0   # folded scalar scales

    COP = LANE                            # lane-dense (zero-padded) output channels
    Wc = _round_up(W + 2, 16)             # conv1-output frame width (1-col halo), 16-aligned
    H2 = H + 2                            # conv1-output frame rows (1-row halo)
    P2 = H * Wc                           # flat output positions (multiple of 16)
    P1 = H2 * Wc
    P1PAD = _round_up(max(P1, P2 + 2 * Wc + 2), 16)
    assert P2 + 2 * Wc + 2 <= P1PAD, "rolled wrap-around rows would be read"

    # ---- activation quantization + conv1 im2col (host/XLA; K = 9*Cin <= 128) ----
    x_nhwc = jnp.transpose(x_nchw, (0, 2, 3, 1)).astype(jnp.float32)
    xq = jnp.clip(jnp.round(x_nhwc * inv_s0), -127.0, 127.0)
    xp = jnp.pad(xq, ((0, 0), (2, 2), (2, Wc - W), (0, 0)))      # (N, H+4, Wc+2, Cin)
    taps = [xp[:, ky:ky + H2, kx:kx + Wc, :] for ky in range(3) for kx in range(3)]
    a1 = jnp.stack(taps, axis=3).reshape(N, P1, 9 * Cin)
    a1 = jnp.pad(a1, ((0, 0), (0, P1PAD - P1), (0, LANE - 9 * Cin)))
    a1 = a1.astype(jnp.bfloat16)          # exact: quantized values are small integers

    # ---- conv2 validity mask (static -> built once on host, resident in VMEM) ----
    idx = np.arange(P1PAD)
    r1, cc = idx // Wc, idx % Wc
    valid = (r1 >= 1) & (r1 <= H) & (cc >= 1) & (cc <= W)
    mask = jnp.asarray(np.repeat(valid[:, None], COP, axis=1).astype(np.float32))

    # ---- weights: taps packed along K, channel-padded, bf16 (exact small ints) ----
    w1q = np.asarray(p["w1q"], np.float32)                  # (Cout, Cin, 3, 3)
    w2q = np.asarray(p["w2q"], np.float32)                  # (Cout, Cout, 3, 3)
    wscq = np.asarray(p["wscq"], np.float32)[:, :, 0, 0]    # (Cout, Cin)
    w1p = np.zeros((LANE, COP), np.float32)
    w2p = np.zeros((9, COP, COP), np.float32)
    for ky in range(3):
        for kx in range(3):
            t = 3 * ky + kx
            w1p[t * Cin:(t + 1) * Cin, :Cout] = w1q[:, :, ky, kx].T
            w2p[t, :Cout, :Cout] = w2q[:, :, ky, kx].T
    wscp = np.zeros((LANE, COP), np.float32)
    wscp[8 * Cin:9 * Cin, :Cout] = wscq.T                   # centre tap of the A1 layout

    def pad_bias(b, scale):
        out = np.zeros((1, COP), np.float32)
        out[0, :Cout] = np.asarray(b, np.float32) * scale   # fold conv/act scales on host
        return jnp.asarray(out)

    w1p = jnp.asarray(w1p, jnp.bfloat16)
    w2p = jnp.asarray(w2p, jnp.bfloat16)
    wscp = jnp.asarray(wscp, jnp.bfloat16)
    bb1 = pad_bias(p["b1"], k1)
    bb2 = pad_bias(p["b2"], k2)
    bbsc = pad_bias(p["bsc"], ksc)

    kernel = _make_kernel(P1PAD, P2, Wc, k1, inv_s1, k2, ksc, _roll_sign())

    flops = 2 * N * (P1PAD * LANE * COP + 9 * P2 * COP * COP + P2 * LANE * COP)
    bytes_accessed = (a1.size * 2 + mask.size * 4
                      + (w1p.size + w2p.size + wscp.size) * 2
                      + (bb1.size + bb2.size + bbsc.size) * 4
                      + N * P2 * COP * 4)

    # grid = (batch,): 2 fully-parallel steps at the test shape, so both v7x
    # TensorCores are fed.  TODO(synk): for large H, split rows across the grid
    # (manual DMA of the 2-row halo) instead of one whole image per step.
    out = pl.pallas_call(
        kernel,
        out_shape=jax.ShapeDtypeStruct((N, P2, COP), jnp.float32),
        grid=(N,),
        in_specs=[
            pl.BlockSpec((None, P1PAD, LANE), lambda n: (n, 0, 0)),   # A1 (im2col)
            pl.BlockSpec((P1PAD, COP), lambda n: (0, 0)),             # conv2 pad mask
            pl.BlockSpec((LANE, COP), lambda n: (0, 0)),              # conv1 weights
            pl.BlockSpec((1, COP), lambda n: (0, 0)),                 # conv1 bias (folded)
            pl.BlockSpec((9, COP, COP), lambda n: (0, 0, 0)),         # conv2 weights
            pl.BlockSpec((1, COP), lambda n: (0, 0)),                 # conv2 bias (folded)
            pl.BlockSpec((LANE, COP), lambda n: (0, 0)),              # shortcut weights
            pl.BlockSpec((1, COP), lambda n: (0, 0)),                 # shortcut bias (folded)
        ],
        out_specs=pl.BlockSpec((None, P2, COP), lambda n: (n, 0, 0)),
        compiler_params=pltpu.CompilerParams(
            dimension_semantics=("parallel",),
            vmem_limit_bytes=32 * 1024 * 1024),   # safe on v7x's 64 MiB physical VMEM
        cost_estimate=pl.CostEstimate(flops=int(flops), transcendentals=0,
                                      bytes_accessed=int(bytes_accessed)),
    )(a1, mask, w1p, bb1, w2p, bb2, wscp, bbsc)

    # ---- glue: flat lane-dense output -> NCHW (crop width / channel padding) ----
    out = out.reshape(N, H, Wc, COP)[:, :, :W, :Cout]
    return jnp.transpose(out, (0, 3, 1, 2))


# ----------------------------- pure-JAX reference -----------------------------
def basic_block_ref(x, p):
    s0, s1 = p["s0"], p["s1"]
    inv_s0, inv_s1 = 1.0 / s0, 1.0 / s1
    dn = ("NCHW", "OIHW", "NCHW")
    xq = jnp.clip(jnp.round(x * inv_s0), -127.0, 127.0)
    y = lax.conv_general_dilated(xq, jnp.asarray(p["w1q"]), (1, 1),
                                 ((1, 1), (1, 1)), dimension_numbers=dn)
    y = (y + jnp.asarray(p["b1"]).reshape(1, -1, 1, 1)) * p["c1"]
    y = jnp.clip(y, 0.0, 6.0 * inv_s0) * s0
    yq = jnp.clip(jnp.round(y * inv_s1), -127.0, 127.0)
    z = lax.conv_general_dilated(yq, jnp.asarray(p["w2q"]), (1, 1),
                                 ((1, 1), (1, 1)), dimension_numbers=dn)
    z = (z + jnp.asarray(p["b2"]).reshape(1, -1, 1, 1)) * p["c2"]
    z = z * s1
    r = lax.conv_general_dilated(xq, jnp.asarray(p["wscq"]), (1, 1),
                                 ((0, 0), (0, 0)), dimension_numbers=dn)
    r = (r + jnp.asarray(p["bsc"]).reshape(1, -1, 1, 1)) * p["csc"]
    r = r * s0
    return jnp.clip(z + r, 0.0, 6.0)


if __name__ == "__main__":
    N, in_planes, planes, H, W = 2, 4, 8, 16, 16
    act_scale = (0.5, 0.25)

    key = jax.random.PRNGKey(0)
    kx, kp = jax.random.split(key)
    x = jax.random.normal(kx, (N, in_planes, H, W), jnp.float32)
    params = build_params(kp, in_planes, planes, act_scale)

    out = jax.block_until_ready(basic_block_pallas(x, params))
    ref = jax.block_until_ready(basic_block_ref(x, params))

    assert out.shape == (N, planes, H, W)
    np.testing.assert_allclose(np.asarray(out), np.asarray(ref),
                               rtol=1e-3, atol=1e-3)
    print("KERNEL_OK")
</pallas_src>

<mosaic_0001>
module attributes {stable_mosaic.version = 11 : i64} {
  func.func @probe(%arg0: memref<8x128xi32, #tpu.memory_space<vmem>>, %arg1: memref<8x128xi32, #tpu.memory_space<vmem>>) attributes {dimension_semantics = [], scalar_prefetch = 0 : i64, scratch_operands = 0 : i64, tpu.core_type = #tpu.core_type<tc>} {
    %c0 = arith.constant 0 : index
    %c0_0 = arith.constant 0 : index
    %0 = vector.load %arg0[%c0, %c0_0] : memref<8x128xi32, #tpu.memory_space<vmem>>, vector<8x128xi32>
    %c1_i32 = arith.constant 1 : i32
    %1 = tpu.dynamic_rotate %0 by %c1_i32 dim 0 : vector<8x128xi32>, i32 -> vector<8x128xi32>
    %c0_1 = arith.constant 0 : index
    %c0_2 = arith.constant 0 : index
    %2 = vector.load %arg1[%c0_1, %c0_2] : memref<8x128xi32, #tpu.memory_space<vmem>>, vector<8x128xi32>
    tpu.vector_store %arg1[%c0_1, %c0_2], %1 {strides = array<i32>} : memref<8x128xi32, #tpu.memory_space<vmem>>, vector<8x128xi32>,
    return
  }
}

</mosaic_0001>

<bundles_post_ra>
// kernel: tpu_custom_call.1
= control target key start
LH: loop header
LB: loop body
LE: loop exit
PB: predicated region body
PF: predicated region fallthrough
CT: control target
= control target key end

     0   :  { %6 = vsyncpa [#allocation3], 0  ;;  %s125_s0 = inlined_call_operand.hbm [shape: s32[8,128], index: 0, kind: input, shape index: {}]   ;;  %s126_s1 = inlined_call_operand.hbm [shape: s32[8,128], index: 1, kind: output, shape index: {}]  }
   0x1   :  { %7 = vsyncpa [#allocation4], 0  ;;  %s89_s6 = smov [#allocation2]   ;;  %s41_s10 = scalar_lea.hbm %s125_s0, 128 }
   0x2   :  { %s14_s7 = sshll.u32 %s89_s6, 4  ;;  %p42_p0 = scmp.ne.s32.totalorder %s125_s0, %s41_s10  ;;  %s15_s7 = int_to_ptr.vmem [resolvable:$true] %s14_s7 }
   0x3   :  { %p45_p1 = scmp.lt.u32.totalorder %s41_s10, %s125_s0 }
   0x5   :  { %p47_p2 = pnand %p45_p1, %p42_p0 }
   0x7   :  { %50 = shalt.err (!%p47_p2)
}
   0x8   :  { %s51_s15 = scalar_lea.vmem %s15_s7, 128  ;;  %p56_p4 = scmp.lt.s32.totalorder %s15_s7, %s15_s7 }
   0x9   :  { %p52_p3 = scmp.ne.s32.totalorder %s15_s7, %s51_s15  ;;  %p57_p5 = scmp.lt.s32.totalorder %s51_s15, %s51_s15 }
   0xb   :  { %p58_p6 = por %p57_p5, %p56_p4 }
   0xd   :  { %p59_p7 = pnand %p58_p6, %p52_p3 }
   0xf   :  { %62 = shalt.err (!%p59_p7)
}
  0x10   :  { %17 = dma.hbm_to_vmem [thread:$0]  %s125_s0, 128, %s15_s7, [#allocation3]  }
  0x11   :  { %85 = dma.done.wait [#allocation3], 128  }
  0x12   :  { %86 = vsyncadd [#allocation3], 4294967168  ;;  %s90_s18 = smov [#allocation5]   ;;  %v21_v0 = vld [vmem:[#allocation2] sm:$0xff] }
  0x13   :  { %s30_s19 = sshll.u32 %s90_s18, 4  ;;  %v22_v1 = vrot.slane %v21_v0, 7  ;;  %s31_s19 = int_to_ptr.vmem [resolvable:$true] %s30_s19 }
  0x14   :  { %s63_s20 = scalar_lea.vmem %s31_s19, 128  ;;  %p68_p9 = scmp.lt.s32.totalorder %s31_s19, %s31_s19 }
  0x15   :  { %23 = vst [vmem:[#allocation5] sm:$0xff] %v22_v1  ;;  %p64_p8 = scmp.ne.s32.totalorder %s31_s19, %s63_s20  ;;  %p69_p10 = scmp.lt.s32.totalorder %s63_s20, %s63_s20 }
  0x17   :  { %p70_p11 = por %p69_p10, %p68_p9 }
  0x19   :  { %p71_p12 = pnand %p70_p11, %p64_p8 }
  0x1b   :  { %74 = shalt.err (!%p71_p12)
}
  0x1c   :  { %s75_s23 = scalar_lea.hbm %s126_s1, 128 }
  0x1d   :  { %p76_p13 = scmp.ne.s32.totalorder %s126_s1, %s75_s23  ;;  %p79_p0 = scmp.lt.u32.totalorder %s75_s23, %s126_s1 }
  0x1f   :  { %p81_p1 = pnand %p79_p0, %p76_p13 }
  0x21   :  { %84 = shalt.err (!%p81_p1)
}
  0x22   :  { %33 = dma.vmem_to_hbm [thread:$0]  %s31_s19, 128, %s126_s1, [#allocation4]  }
  0x23   :  { %87 = dma.done.wait [#allocation4], 128  }
  0x24   :  { %88 = vsyncadd [#allocation4], 4294967168 }
  0x25   :  { %37 = vsyncpa [#allocation3], 1 }
  0x26   :  { %38 = vsyncpa [#allocation4], 1 }

</bundles_post_ra>
